<compile_context>
chip_gen: v7x
topology: tpu7x:2x2x1
jax: 0.10.0
libtpu: 0.0.40
codegen_flags: <defaults>
</compile_context>

<pallas_src>
import functools

import numpy as np
import jax
import jax.numpy as jnp
from jax.experimental import pallas as pl
from jax.experimental.pallas import tpu as pltpu


def _quad_deconv_kernel(x_ref, w_ref, o_ref, cols_ref, *, TH, KH, KW, Wo):
    """One (batch, row-tile) step of the fused QuadDeconv.

    x_ref    : (Cin, Hp, Wp)            zero-padded NCHW input (resident per batch)
    w_ref    : (3*Cpad, 2*KH*KW*Cin+1)  fused flipped weights + bias column
    o_ref    : (Cout, TH*Wo)            lane-dense NCHW output row tile (rows flattened)
    cols_ref : (2*KH*KW*Cin+1, TH*Wo)   VMEM scratch: im2col of [x taps | x^2 taps | 1]
    """
    Cin = x_ref.shape[0]
    Cout = o_ref.shape[0]
    Cpad = w_ref.shape[0] // 3
    K2 = KH * KW
    L = TH * Wo

    h = pl.program_id(1)
    row0 = pl.multiple_of(h * TH, TH)
    # Halo'd row slab of the padded input needed by this output row tile.
    x_tile = x_ref[:, pl.ds(row0, TH + KH - 1), :]          # (Cin, TH+KH-1, Wp)

    # Build the im2col buffer ONCE per tile into VMEM scratch:
    #   rows [t*Cin, (t+1)*Cin)            -> tap t of x
    #   rows [(K2+t)*Cin, (K2+t+1)*Cin)    -> tap t of x*x
    #   last row                            -> ones (folds the biases into the matmul)
    for kh in range(KH):
        for kw in range(KW):
            t = kh * KW + kw
            p = x_tile[:, kh:kh + TH, kw:kw + Wo].reshape(Cin, L)
            cols_ref[t * Cin:(t + 1) * Cin, :] = p
            cols_ref[(K2 + t) * Cin:(K2 + t + 1) * Cin, :] = p * p
    cols_ref[2 * K2 * Cin:, :] = jnp.ones((1, L), dtype=x_tile.dtype)

    # Single wide MXU matmul: all taps, all three branches, biases included.
    y = jnp.dot(w_ref[...], cols_ref[...],
                preferred_element_type=jnp.float32)          # (3*Cpad, L)

    y1 = y[0:Cout]
    y2 = y[Cpad:Cpad + Cout]
    y3 = y[2 * Cpad:2 * Cpad + Cout]
    o_ref[...] = (y1 * y2 + y3).astype(o_ref.dtype)


def _pick_row_tile(Ho, Wo):
    """Smallest output-row tile whose flattened width is a multiple of 128 lanes
    (preferring >= 8192 lanes per tile); falls back to the whole image."""
    best = None
    for th in range(1, Ho + 1):
        if Ho % th:
            continue
        if (th * Wo) % 128 == 0:
            if th * Wo >= 8192:
                return th
            if best is None:
                best = th
    return best if best is not None else Ho


@functools.partial(jax.jit, static_argnames=("padding",))
def quad_deconv(x_nchw, W_r, W_g, W_b, b_r, b_g, b_b, padding="same"):
    """QuadDeconv forward with PyTorch semantics (NCHW in / NCHW out)."""
    if padding not in ("valid", "same"):
        raise ValueError(f"Padding must be one of ['valid', 'same']. Got {padding}!")

    N, Cin, H, W = x_nchw.shape
    Cin_w, Cout, KH, KW = W_r.shape
    assert Cin_w == Cin
    K2 = KH * KW

    pad = int(np.ceil((KH - 1) / 2)) if padding == "same" else 0
    qh, qw = KH - 1 - pad, KW - 1 - pad
    Ho = H + KH - 1 - 2 * pad
    Wo = W + KW - 1 - 2 * pad

    # Zero-pad so the stride-1 transposed conv becomes a plain flipped-kernel
    # convolution.  Input stays NCHW (rows on sublanes, cols on lanes): no
    # NHWC transpose anywhere in the pipeline.
    xp = jnp.pad(x_nchw.astype(jnp.float32),
                 ((0, 0), (0, 0), (qh, qh), (qw, qw)))
    Hp, Wp = int(xp.shape[2]), int(xp.shape[3])

    # --- Build the fused, flipped, transposed weight matrix (host/XLA side) ---
    # y_all = W_fused @ [x_taps ; x^2_taps ; 1]  with
    #   W_fused = [[Wr^T, 0, b_r], [Wg^T, 0, b_g], [0, Wb^T, b_b]]
    # Each branch block is padded to Cpad rows (multiple of 8) for aligned slices.
    def flat_T(Wt):
        # [Cin, Cout, KH, KW] -> spatial flip -> (Cout, K2*Cin), tap-major order.
        Wf = jnp.transpose(Wt[:, :, ::-1, ::-1], (2, 3, 0, 1))      # (KH,KW,Cin,Cout)
        return jnp.transpose(Wf.reshape(K2, Cin, Cout), (2, 0, 1)).reshape(Cout, K2 * Cin)

    A = flat_T(W_r.astype(jnp.float32))
    G = flat_T(W_g.astype(jnp.float32))
    B = flat_T(W_b.astype(jnp.float32))
    Z = jnp.zeros_like(A)
    Cpad = ((Cout + 7) // 8) * 8

    def branch_block(x_part, sq_part, bias):
        blk = jnp.concatenate(
            [x_part, sq_part, bias.astype(jnp.float32).reshape(Cout, 1)], axis=1)
        return jnp.pad(blk, ((0, Cpad - Cout), (0, 0)))

    w_fused = jnp.concatenate(
        [branch_block(A, Z, b_r),
         branch_block(G, Z, b_g),
         branch_block(Z, B, b_b)], axis=0)          # (3*Cpad, 2*K2*Cin + 1)
    Krows = 2 * K2 * Cin + 1

    TH = _pick_row_tile(Ho, Wo)
    L = TH * Wo
    grid = (N, Ho // TH)

    kernel = functools.partial(_quad_deconv_kernel, TH=TH, KH=KH, KW=KW, Wo=Wo)

    # NOTE: the full padded image stays VMEM-resident per batch element (its
    # block index is constant along the row-tile axis, so it is DMA'd only when
    # the batch index changes).  For very large LDCT images a manual halo'd DMA
    # pipeline on the H axis would be the next step.
    out_flat = pl.pallas_call(
        kernel,
        out_shape=jax.ShapeDtypeStruct((N, Cout, Ho * Wo), jnp.float32),
        grid=grid,
        in_specs=[
            pl.BlockSpec((None, Cin, Hp, Wp), lambda n, h: (n, 0, 0, 0)),
            pl.BlockSpec((3 * Cpad, Krows), lambda n, h: (0, 0)),
        ],
        # Lane-dense NCHW output: last dim = flattened output rows of this tile.
        out_specs=pl.BlockSpec((None, Cout, L), lambda n, h: (n, 0, h)),
        scratch_shapes=[pltpu.VMEM((Krows, L), jnp.float32)],
        compiler_params=pltpu.CompilerParams(
            dimension_semantics=("parallel", "parallel"),
            vmem_limit_bytes=48 * 1024 * 1024,
        ),
    )(xp, w_fused)

    return out_flat.reshape(N, Cout, Ho, Wo)


def _reference(x, W_r, W_g, W_b, b_r, b_g, b_b, padding):
    """Independent numpy reference: scatter-form transposed convolution (NCHW)."""
    N, Cin, H, W = x.shape
    _, Cout, KH, KW = W_r.shape
    pad = int(np.ceil((KH - 1) / 2)) if padding == "same" else 0
    Ho = H + KH - 1 - 2 * pad
    Wo = W + KW - 1 - 2 * pad

    def ct(xin, Wt, b):
        yf = np.zeros((N, Cout, H + KH - 1, W + KW - 1), np.float64)
        for kh in range(KH):
            for kw in range(KW):
                yf[:, :, kh:kh + H, kw:kw + W] += np.einsum(
                    "nchw,cd->ndhw",
                    xin.astype(np.float64),
                    Wt[:, :, kh, kw].astype(np.float64))
        y = yf[:, :, pad:pad + Ho, pad:pad + Wo]
        return y + b.reshape(1, Cout, 1, 1).astype(np.float64)

    x1 = ct(x, W_r, b_r)
    x2 = ct(x, W_g, b_g)
    x3 = ct(x * x, W_b, b_b)
    return (x1 * x2 + x3).astype(np.float32)


if __name__ == "__main__":
    key = jax.random.PRNGKey(0)
    N, Cin, Cout, H, W, K = 2, 4, 4, 16, 16, 3

    kx, kr, kg, kb = jax.random.split(key, 4)
    x = jax.random.normal(kx, (N, Cin, H, W), dtype=jnp.float32)

    # Parameters exactly as in QuadDeconv.__init__:
    #   W_r ~ truncnorm(-2, 2, scale=0.1); W_g = W_b = 0; b_r = b_b = 0; b_g = 1
    W_r = 0.1 * jax.random.truncated_normal(kr, -2.0, 2.0, (Cin, Cout, K, K), jnp.float32)
    W_g = jnp.zeros((Cin, Cout, K, K), jnp.float32)
    W_b = jnp.zeros((Cin, Cout, K, K), jnp.float32)
    b_r = jnp.zeros((Cout,), jnp.float32)
    b_g = jnp.ones((Cout,), jnp.float32)
    b_b = jnp.zeros((Cout,), jnp.float32)

    out = jax.block_until_ready(
        quad_deconv(x, W_r, W_g, W_b, b_r, b_g, b_b, padding="same"))
    ref = _reference(np.asarray(x), np.asarray(W_r), np.asarray(W_g), np.asarray(W_b),
                     np.asarray(b_r), np.asarray(b_g), np.asarray(b_b), "same")
    assert out.shape == (N, Cout, H, W), out.shape
    assert np.allclose(np.asarray(out), ref, rtol=1e-4, atol=1e-4), "mismatch (init params)"

    # Extra self-tests: all three branches non-trivial; both padding modes
    # (exercises the lane-aligned row-tile path and the full-image fallback).
    W_g2 = 0.1 * jax.random.truncated_normal(kg, -2.0, 2.0, (Cin, Cout, K, K), jnp.float32)
    W_b2 = 0.1 * jax.random.truncated_normal(kb, -2.0, 2.0, (Cin, Cout, K, K), jnp.float32)
    for padding in ("same", "valid"):
        out2 = jax.block_until_ready(
            quad_deconv(x, W_r, W_g2, W_b2, b_r, b_g, b_b, padding=padding))
        ref2 = _reference(np.asarray(x), np.asarray(W_r), np.asarray(W_g2), np.asarray(W_b2),
                          np.asarray(b_r), np.asarray(b_g), np.asarray(b_b), padding)
        assert out2.shape == ref2.shape, (out2.shape, ref2.shape)
        assert np.allclose(np.asarray(out2), ref2, rtol=1e-4, atol=1e-4), f"mismatch ({padding})"

    print("KERNEL_OK")
</pallas_src>

<mosaic_0001>
module attributes {stable_mosaic.version = 11 : i64} {
  func.func @_quad_deconv_kernel(%arg0: i32, %arg1: i32, %arg2: memref<1x4x18x18xf32, #tpu.memory_space<vmem>>, %arg3: memref<24x73xf32, #tpu.memory_space<vmem>>, %arg4: memref<1x4x128xf32, #tpu.memory_space<vmem>>, %arg5: memref<73x128xf32, #tpu.memory_space<vmem>>) attributes {dimension_semantics = [#tpu.dimension_semantics<parallel>, #tpu.dimension_semantics<parallel>], iteration_bounds = array<i64: 2, 2>, scalar_prefetch = 0 : i64, scratch_operands = 1 : i64, tpu.core_type = #tpu.core_type<tc>, window_params = [{transform_indices = @transform_0, window_bounds = array<i64: 1, 4, 18, 18>}, {pipeline_mode = #tpu.pipeline_mode<synchronous>, transform_indices = @transform_1, window_bounds = array<i64: 24, 73>}, {transform_indices = @transform_2, window_bounds = array<i64: 1, 4, 128>}]} {
    %c8_i32 = arith.constant 8 : i32
    %0 = arith.muli %arg1, %c8_i32 : i32
    %1 = tpu.assume_multiple %0, 8 : i32
    %c0 = arith.constant 0 : index
    %c0_0 = arith.constant 0 : index
    %2 = arith.index_cast %1 : i32 to index
    %c0_1 = arith.constant 0 : index
    %3 = vector.load %arg2[%c0, %c0_0, %2, %c0_1] : memref<1x4x18x18xf32, #tpu.memory_space<vmem>>, vector<1x4x10x18xf32>
    %4 = vector.shape_cast %3 : vector<1x4x10x18xf32> to vector<4x10x18xf32>
    %5 = vector.extract_strided_slice %4 {offsets = [0, 0, 0], sizes = [4, 8, 16], strides = [1, 1, 1]} : vector<4x10x18xf32> to vector<4x8x16xf32>
    %6 = vector.shape_cast %5 : vector<4x8x16xf32> to vector<4x128xf32>
    %c0_2 = arith.constant 0 : index
    %c0_3 = arith.constant 0 : index
    %7 = vector.load %arg5[%c0_2, %c0_3] : memref<73x128xf32, #tpu.memory_space<vmem>>, vector<4x128xf32>
    tpu.vector_store %arg5[%c0_2, %c0_3], %6 {strides = array<i32>} : memref<73x128xf32, #tpu.memory_space<vmem>>, vector<4x128xf32>,
    %8 = arith.mulf %6, %6 : vector<4x128xf32>
    %c36 = arith.constant 36 : index
    %c0_4 = arith.constant 0 : index
    %9 = vector.load %arg5[%c36, %c0_4] : memref<73x128xf32, #tpu.memory_space<vmem>>, vector<4x128xf32>
    tpu.vector_store %arg5[%c36, %c0_4], %8 {strides = array<i32>} : memref<73x128xf32, #tpu.memory_space<vmem>>, vector<4x128xf32>,
    %10 = vector.extract_strided_slice %4 {offsets = [0, 0, 1], sizes = [4, 8, 16], strides = [1, 1, 1]} : vector<4x10x18xf32> to vector<4x8x16xf32>
    %11 = vector.shape_cast %10 : vector<4x8x16xf32> to vector<4x128xf32>
    %c4 = arith.constant 4 : index
    %c0_5 = arith.constant 0 : index
    %12 = vector.load %arg5[%c4, %c0_5] : memref<73x128xf32, #tpu.memory_space<vmem>>, vector<4x128xf32>
    tpu.vector_store %arg5[%c4, %c0_5], %11 {strides = array<i32>} : memref<73x128xf32, #tpu.memory_space<vmem>>, vector<4x128xf32>,
    %13 = arith.mulf %11, %11 : vector<4x128xf32>
    %c40 = arith.constant 40 : index
    %c0_6 = arith.constant 0 : index
    %14 = vector.load %arg5[%c40, %c0_6] : memref<73x128xf32, #tpu.memory_space<vmem>>, vector<4x128xf32>
    tpu.vector_store %arg5[%c40, %c0_6], %13 {strides = array<i32>} : memref<73x128xf32, #tpu.memory_space<vmem>>, vector<4x128xf32>,
    %15 = vector.extract_strided_slice %4 {offsets = [0, 0, 2], sizes = [4, 8, 16], strides = [1, 1, 1]} : vector<4x10x18xf32> to vector<4x8x16xf32>
    %16 = vector.shape_cast %15 : vector<4x8x16xf32> to vector<4x128xf32>
    %c8 = arith.constant 8 : index
    %c0_7 = arith.constant 0 : index
    %17 = vector.load %arg5[%c8, %c0_7] : memref<73x128xf32, #tpu.memory_space<vmem>>, vector<4x128xf32>
    tpu.vector_store %arg5[%c8, %c0_7], %16 {strides = array<i32>} : memref<73x128xf32, #tpu.memory_space<vmem>>, vector<4x128xf32>,
    %18 = arith.mulf %16, %16 : vector<4x128xf32>
    %c44 = arith.constant 44 : index
    %c0_8 = arith.constant 0 : index
    %19 = vector.load %arg5[%c44, %c0_8] : memref<73x128xf32, #tpu.memory_space<vmem>>, vector<4x128xf32>
    tpu.vector_store %arg5[%c44, %c0_8], %18 {strides = array<i32>} : memref<73x128xf32, #tpu.memory_space<vmem>>, vector<4x128xf32>,
    %20 = vector.extract_strided_slice %4 {offsets = [0, 1, 0], sizes = [4, 8, 16], strides = [1, 1, 1]} : vector<4x10x18xf32> to vector<4x8x16xf32>
    %21 = vector.shape_cast %20 : vector<4x8x16xf32> to vector<4x128xf32>
    %c12 = arith.constant 12 : index
    %c0_9 = arith.constant 0 : index
    %22 = vector.load %arg5[%c12, %c0_9] : memref<73x128xf32, #tpu.memory_space<vmem>>, vector<4x128xf32>
    tpu.vector_store %arg5[%c12, %c0_9], %21 {strides = array<i32>} : memref<73x128xf32, #tpu.memory_space<vmem>>, vector<4x128xf32>,
    %23 = arith.mulf %21, %21 : vector<4x128xf32>
    %c48 = arith.constant 48 : index
    %c0_10 = arith.constant 0 : index
    %24 = vector.load %arg5[%c48, %c0_10] : memref<73x128xf32, #tpu.memory_space<vmem>>, vector<4x128xf32>
    tpu.vector_store %arg5[%c48, %c0_10], %23 {strides = array<i32>} : memref<73x128xf32, #tpu.memory_space<vmem>>, vector<4x128xf32>,
    %25 = vector.extract_strided_slice %4 {offsets = [0, 1, 1], sizes = [4, 8, 16], strides = [1, 1, 1]} : vector<4x10x18xf32> to vector<4x8x16xf32>
    %26 = vector.shape_cast %25 : vector<4x8x16xf32> to vector<4x128xf32>
    %c16 = arith.constant 16 : index
    %c0_11 = arith.constant 0 : index
    %27 = vector.load %arg5[%c16, %c0_11] : memref<73x128xf32, #tpu.memory_space<vmem>>, vector<4x128xf32>
    tpu.vector_store %arg5[%c16, %c0_11], %26 {strides = array<i32>} : memref<73x128xf32, #tpu.memory_space<vmem>>, vector<4x128xf32>,
    %28 = arith.mulf %26, %26 : vector<4x128xf32>
    %c52 = arith.constant 52 : index
    %c0_12 = arith.constant 0 : index
    %29 = vector.load %arg5[%c52, %c0_12] : memref<73x128xf32, #tpu.memory_space<vmem>>, vector<4x128xf32>
    tpu.vector_store %arg5[%c52, %c0_12], %28 {strides = array<i32>} : memref<73x128xf32, #tpu.memory_space<vmem>>, vector<4x128xf32>,
    %30 = vector.extract_strided_slice %4 {offsets = [0, 1, 2], sizes = [4, 8, 16], strides = [1, 1, 1]} : vector<4x10x18xf32> to vector<4x8x16xf32>
    %31 = vector.shape_cast %30 : vector<4x8x16xf32> to vector<4x128xf32>
    %c20 = arith.constant 20 : index
    %c0_13 = arith.constant 0 : index
    %32 = vector.load %arg5[%c20, %c0_13] : memref<73x128xf32, #tpu.memory_space<vmem>>, vector<4x128xf32>
    tpu.vector_store %arg5[%c20, %c0_13], %31 {strides = array<i32>} : memref<73x128xf32, #tpu.memory_space<vmem>>, vector<4x128xf32>,
    %33 = arith.mulf %31, %31 : vector<4x128xf32>
    %c56 = arith.constant 56 : index
    %c0_14 = arith.constant 0 : index
    %34 = vector.load %arg5[%c56, %c0_14] : memref<73x128xf32, #tpu.memory_space<vmem>>, vector<4x128xf32>
    tpu.vector_store %arg5[%c56, %c0_14], %33 {strides = array<i32>} : memref<73x128xf32, #tpu.memory_space<vmem>>, vector<4x128xf32>,
    %35 = vector.extract_strided_slice %4 {offsets = [0, 2, 0], sizes = [4, 8, 16], strides = [1, 1, 1]} : vector<4x10x18xf32> to vector<4x8x16xf32>
    %36 = vector.shape_cast %35 : vector<4x8x16xf32> to vector<4x128xf32>
    %c24 = arith.constant 24 : index
    %c0_15 = arith.constant 0 : index
    %37 = vector.load %arg5[%c24, %c0_15] : memref<73x128xf32, #tpu.memory_space<vmem>>, vector<4x128xf32>
    tpu.vector_store %arg5[%c24, %c0_15], %36 {strides = array<i32>} : memref<73x128xf32, #tpu.memory_space<vmem>>, vector<4x128xf32>,
    %38 = arith.mulf %36, %36 : vector<4x128xf32>
    %c60 = arith.constant 60 : index
    %c0_16 = arith.constant 0 : index
    %39 = vector.load %arg5[%c60, %c0_16] : memref<73x128xf32, #tpu.memory_space<vmem>>, vector<4x128xf32>
    tpu.vector_store %arg5[%c60, %c0_16], %38 {strides = array<i32>} : memref<73x128xf32, #tpu.memory_space<vmem>>, vector<4x128xf32>,
    %40 = vector.extract_strided_slice %4 {offsets = [0, 2, 1], sizes = [4, 8, 16], strides = [1, 1, 1]} : vector<4x10x18xf32> to vector<4x8x16xf32>
    %41 = vector.shape_cast %40 : vector<4x8x16xf32> to vector<4x128xf32>
    %c28 = arith.constant 28 : index
    %c0_17 = arith.constant 0 : index
    %42 = vector.load %arg5[%c28, %c0_17] : memref<73x128xf32, #tpu.memory_space<vmem>>, vector<4x128xf32>
    tpu.vector_store %arg5[%c28, %c0_17], %41 {strides = array<i32>} : memref<73x128xf32, #tpu.memory_space<vmem>>, vector<4x128xf32>,
    %43 = arith.mulf %41, %41 : vector<4x128xf32>
    %c64 = arith.constant 64 : index
    %c0_18 = arith.constant 0 : index
    %44 = vector.load %arg5[%c64, %c0_18] : memref<73x128xf32, #tpu.memory_space<vmem>>, vector<4x128xf32>
    tpu.vector_store %arg5[%c64, %c0_18], %43 {strides = array<i32>} : memref<73x128xf32, #tpu.memory_space<vmem>>, vector<4x128xf32>,
    %45 = vector.extract_strided_slice %4 {offsets = [0, 2, 2], sizes = [4, 8, 16], strides = [1, 1, 1]} : vector<4x10x18xf32> to vector<4x8x16xf32>
    %46 = vector.shape_cast %45 : vector<4x8x16xf32> to vector<4x128xf32>
    %c32 = arith.constant 32 : index
    %c0_19 = arith.constant 0 : index
    %47 = vector.load %arg5[%c32, %c0_19] : memref<73x128xf32, #tpu.memory_space<vmem>>, vector<4x128xf32>
    tpu.vector_store %arg5[%c32, %c0_19], %46 {strides = array<i32>} : memref<73x128xf32, #tpu.memory_space<vmem>>, vector<4x128xf32>,
    %48 = arith.mulf %46, %46 : vector<4x128xf32>
    %c68 = arith.constant 68 : index
    %c0_20 = arith.constant 0 : index
    %49 = vector.load %arg5[%c68, %c0_20] : memref<73x128xf32, #tpu.memory_space<vmem>>, vector<4x128xf32>
    tpu.vector_store %arg5[%c68, %c0_20], %48 {strides = array<i32>} : memref<73x128xf32, #tpu.memory_space<vmem>>, vector<4x128xf32>,
    %cst = arith.constant 1.000000e+00 : f32
    %50 = vector.broadcast %cst : f32 to vector<1x128xf32>
    %c72 = arith.constant 72 : index
    %c0_21 = arith.constant 0 : index
    %51 = vector.load %arg5[%c72, %c0_21] : memref<73x128xf32, #tpu.memory_space<vmem>>, vector<1x128xf32>
    tpu.vector_store %arg5[%c72, %c0_21], %50 {strides = array<i32>} : memref<73x128xf32, #tpu.memory_space<vmem>>, vector<1x128xf32>,
    %c0_22 = arith.constant 0 : index
    %c0_23 = arith.constant 0 : index
    %52 = vector.load %arg3[%c0_22, %c0_23] : memref<24x73xf32, #tpu.memory_space<vmem>>, vector<24x73xf32>
    %c0_24 = arith.constant 0 : index
    %c0_25 = arith.constant 0 : index
    %53 = vector.load %arg5[%c0_24, %c0_25] : memref<73x128xf32, #tpu.memory_space<vmem>>, vector<73x128xf32>
    %cst_26 = arith.constant dense<0.000000e+00> : vector<24x128xf32>
    %54 = tpu.matmul %52, %53, %cst_26 {dimension_numbers = #tpu.dot_dimension_numbers<[1], [0], [0], [1], [0, 0, 1, 1], [], []>} : vector<24x73xf32>, vector<73x128xf32>, vector<24x128xf32> -> vector<24x128xf32>
    %55 = vector.extract_strided_slice %54 {offsets = [0, 0], sizes = [4, 128], strides = [1, 1]} : vector<24x128xf32> to vector<4x128xf32>
    %56 = vector.extract_strided_slice %54 {offsets = [8, 0], sizes = [4, 128], strides = [1, 1]} : vector<24x128xf32> to vector<4x128xf32>
    %57 = vector.extract_strided_slice %54 {offsets = [16, 0], sizes = [4, 128], strides = [1, 1]} : vector<24x128xf32> to vector<4x128xf32>
    %58 = arith.mulf %55, %56 : vector<4x128xf32>
    %59 = arith.addf %58, %57 : vector<4x128xf32>
    %c0_27 = arith.constant 0 : index
    %c0_28 = arith.constant 0 : index
    %c0_29 = arith.constant 0 : index
    %60 = vector.load %arg4[%c0_27, %c0_28, %c0_29] : memref<1x4x128xf32, #tpu.memory_space<vmem>>, vector<1x4x128xf32>
    %61 = vector.shape_cast %60 : vector<1x4x128xf32> to vector<4x128xf32>
    %62 = vector.shape_cast %59 : vector<4x128xf32> to vector<1x4x128xf32>
    tpu.vector_store %arg4[%c0_27, %c0_28, %c0_29], %62 {strides = array<i32>} : memref<1x4x128xf32, #tpu.memory_space<vmem>>, vector<1x4x128xf32>,
    return
  }
  func.func @transform_0(%arg0: i32, %arg1: i32) -> (i32, i32, i32, i32) {
    %c0_i32 = arith.constant 0 : i32
    %c0_i32_0 = arith.constant 0 : i32
    %c0_i32_1 = arith.constant 0 : i32
    %c0_i32_2 = arith.constant 0 : i32
    return %arg0, %c0_i32, %c0_i32_0, %c0_i32_1 : i32, i32, i32, i32
  }
  func.func @transform_1(%arg0: i32, %arg1: i32) -> (i32, i32) {
    %c0_i32 = arith.constant 0 : i32
    %c0_i32_0 = arith.constant 0 : i32
    %c0_i32_1 = arith.constant 0 : i32
    return %c0_i32, %c0_i32_0 : i32, i32
  }
  func.func @transform_2(%arg0: i32, %arg1: i32) -> (i32, i32, i32) {
    %c0_i32 = arith.constant 0 : i32
    %c0_i32_0 = arith.constant 0 : i32
    return %arg0, %c0_i32, %arg1 : i32, i32, i32
  }
}

</mosaic_0001>

<bundles_post_ra>
// kernel: quad_deconv.1
= control target key start
LH: loop header
LB: loop body
LE: loop exit
PB: predicated region body
PF: predicated region fallthrough
CT: control target
= control target key end

     0   :  { %s1657_s9 = smov 0   ;;  %s1659_s10 = smov 0   ;;  %s2230_s0 = inlined_call_operand.vmem [shape: f32[2,4,18,18], index: 0, kind: input, shape index: {}]   ;;  %s2231_s1 = inlined_call_operand.vmem [shape: f32[24,73], index: 1, kind: input, shape index: {}]   ;;  %s2232_s2 = inlined_call_operand.vmem [shape: f32[2,4,256], index: 2, kind: output, shape index: {}]  }
   0x1   :  { %s1661_s11 = smov 0   ;;  %s1663_s12 = smov 0  }
   0x2   :  { %s1665_s13 = smov 0  }
   0x3 LB: > { %s21_s14 = sadd.s32 1, %s1616_s11  ;;  %s24_s15 = sadd.s32 1, %s1620_s12  ;;  %s1624_s13 = sphi %s1665_s13, %s12_s13   ;;  %s1620_s12 = sphi %s1663_s12, %s2236_s12   ;;  %s1616_s11 = sphi %s1661_s11, %s2235_s11   ;;  %s1612_s10 = sphi %s1659_s10, %s2234_s10   ;;  %s1608_s9 = sphi %s1657_s9, %s2233_s9  }
   0x4   : > { %p22_p0 = scmp.ge.s32.totalorder %s21_s14, 2  ;;  %p1446_p1 = scmp.ge.s32.totalorder %s1624_s13, 1 }
   0x5   : > { %p126_p2 = scmp.lt.s32.totalorder %s1624_s13, 5 }
   0x6   : > { %s2238_s14 = smov (%p22_p0, %s21_s14), 0  ;;  %s2240_s15 = smov (!%p22_p0, %s24_s15), %s1620_s12 }
   0x7   : > { %p127_p3 = pnand %p1446_p1, %p126_p2  ;;  %p26_p4 = scmp.ge.s32.totalorder %s2240_s15, 2 }
   0x8   : > { %p151_p5 = scmp.lt.s32.totalorder (!%p127_p3), %s1612_s10, 1  ;;  %s1450_s17 = sshll.u32 (!%p127_p3), %s1608_s9, 3  ;;  %vm531_vm0 = vcmask (!%p127_p3), 1046528   ;;  %v1628_v20 = vmov (!%p127_p3), 1983009808   ;;  %v179_v22 = vlaneseq (!%p127_p3)  ;;  %vm890_vm1 = vcmask (!%p127_p3), 1045504  }
   0x9   : > { %s2242_s15 = smov (%p26_p4, %s2240_s15), 0  ;;  %130 = sbr.rel (%p127_p3) target bundleno = 598 (0x256), region = 28 }
   0xa   : > { %s1626_s22 = smov (!%p127_p3), 127   ;;  %s1627_s23 = smov (!%p127_p3), 126   ;;  %v177_v21 = vunpack.c.l.s4 (!%p127_p3), %v1628_v20  ;;  %v180_v24 = vshrl.u32 (!%p127_p3), %v179_v22, 7  ;;  %v1629_v32 = vmov (!%p127_p3), 1934713408   ;;  %v1630_v59 = vmov (!%p127_p3), 0.0  }
   0xb   : > { %v209_v33 = vunpack.c.l.s4 (!%p127_p3), %v1629_v32  ;;  %s1631_s24 = smov (!%p127_p3), 16   ;;  %s1632_s25 = smov (!%p127_p3), 32   ;;  %vm270_vm2 = vcmask (!%p127_p3), 130048   ;;  %vm272_vm3 = vcmask (!%p127_p3), 261120   ;;  %vm274_vm4 = vcmask (!%p127_p3), 392192  }
   0xc   : > { %v178_v23 = vunpack.c.0.s8 (!%p127_p3), %v177_v21  ;;  %s1633_s26 = smov (!%p127_p3), 48   ;;  %s1634_s27 = smov (!%p127_p3), 64   ;;  %vm276_vm5 = vcmask (!%p127_p3), 523264   ;;  %vm278_vm6 = vcmask (!%p127_p3), 654336   ;;  %vm280_vm7 = vcmask (!%p127_p3), 785408  }
   0xd   : > { %v210_v46 = vunpack.c.0.s8 (!%p127_p3), %v209_v33  ;;  %s1635_s28 = smov (!%p127_p3), 80   ;;  %s1636_s29 = smov (!%p127_p3), 96   ;;  %vm282_vm8 = vcmask (!%p127_p3), 916480   ;;  %vm1640_vm9 = vmmov (!%p127_p3), 0   ;;  %vm1273_vm10 = vcmask (!%p127_p3), 1040384  }
   0xe   : > { %v1746_v29 = vsub.s32 (!%p127_p3), %v178_v23, %v180_v24  ;;  %s1637_s30 = smov (!%p127_p3), 112   ;;  %1490 = vmatprep.mubr.msk.f32.mxu0 (!%p127_p3), %vm1640_vm9, %v1630_v59  ;;  %1493 = vmatprep.mubr.msk.f32.mxu1 (!%p127_p3), %vm1640_vm9, %v1630_v59  ;;  %vm1641_vm11 = vmmov (!%p127_p3), 1   ;;  %vm1263_vm13 = vcmask (!%p127_p3), 596992   ;;  %p158_p6 = scmp.lt.s32.totalorder (!%p127_p3), %s1608_s9, 1 }
   0xf   : > { %v1786_v50 = vsub.s32 (!%p127_p3), %v210_v46, %v180_v24  ;;  %vm1513_vm12 = vmpackc.low (!%p127_p3), %vm1273_vm10, %vm1641_vm11 }
  0x10   : > { %s2244_s10 = smov (!%p151_p5, %s1612_s10), 1  ;;  %s2246_s9 = smov (!%p158_p6, %s1608_s9), 1 }
  0x11   : > { %s1525_s16 = smul.u32 96, %s2244_s10 }
  0x13   : > { %s155_s20 = scalar_lea.vmem %s2230_s0, %s1525_s16  ;;  %s1448_s16 = sshll.u32 %s2244_s10, 1 }
  0x14   : > { %s165_s21 = scalar_lea.vmem %s155_s20, %s1450_s17  ;;  %s161_s17 = sadd.s32 %s1448_s16, %s2246_s9 }
  0x15   : > { %v1696_v0 = vld [vmem:[%s165_s21 + $0x30] sm:$0xff]  ;;  %v1698_v1 = vld [vmem:[%s165_s21] sm:$0xff]  ;;  %v1704_v2 = vld [vmem:[%s165_s21 + $0x48] sm:$0xff]  ;;  %s1449_s18 = sshll.u32 %s161_s17, 2 }
  0x16   : > { %295 = vrot.lane.b32.xlu1 %v1696_v0, %s1626_s22  ;;  %291 = vrot.lane.b32.xlu0 %v1698_v1, %s1626_s22  ;;  %v1706_v3 = vld [vmem:[%s165_s21 + $0x18] sm:$0xff]  ;;  %v169_v4 = vld [vmem:[%s165_s21 + $0x20] sm:$0x3]  ;;  %v532_v8 = vrot.slane %v1698_v1, 1  ;;  %v541_v12 = vrot.slane %v1704_v2, 1  ;;  %v538_v13 = vrot.slane %v1696_v0, 1  ;;  %v174_v31 = vcombine.low %v1698_v1, %v1696_v0 }
  0x17   : > { %v167_v5 = vld [vmem:[%s165_s21 + $0x8] sm:$0x3]  ;;  %v535_v6 = vrot.slane %v1706_v3, 1  ;;  %v536_v7 = vrot.slane %v169_v4, 1  ;;  %v173_v10 = vld [vmem:[%s165_s21 + $0x50] sm:$0x3]  ;;  %v190_v37 = vcombine.low %v1706_v3, %v1704_v2  ;;  %v175_v54 = vcombine.high %v1698_v1, %v1696_v0 }
  0x18   : > { %v533_v9 = vrot.slane %v167_v5, 1  ;;  %v171_v11 = vld [vmem:[%s165_s21 + $0x38] sm:$0x3]  ;;  %v542_v16 = vrot.slane %v173_v10, 1  ;;  %v894_v25 = vrot.slane %v1706_v3, 2  ;;  %v895_v26 = vrot.slane %v169_v4, 2  ;;  %s163_s21 = scalar_lea.vmem %s2232_s2, %s1449_s18 }
  0x19   : > { %v1724_v14 = vsel %vm531_vm0, %v535_v6, %v536_v7  ;;  %v539_v17 = vrot.slane %v171_v11, 1  ;;  %v891_v27 = vrot.slane %v1698_v1, 2  ;;  %v892_v28 = vrot.slane %v167_v5, 2 }
  0x1a   : > { %297 = vrot.lane.b32.xlu1 %v1704_v2, %s1626_s22  ;;  %293 = vrot.lane.b32.xlu0 %v1706_v3, %s1626_s22  ;;  %v1726_v15 = vsel %vm531_vm0, %v532_v8, %v533_v9  ;;  %v1732_v18 = vsel %vm531_vm0, %v541_v12, %v542_v16  ;;  %v1759_v35 = vsel %vm890_vm1, %v894_v25, %v895_v26  ;;  %v900_v36 = vrot.slane %v1704_v2, 2 }
  0x1b   : > { %v1734_v19 = vsel %vm531_vm0, %v538_v13, %v539_v17  ;;  %v564_v30 = vcombine.low %v1724_v14, %v1732_v18  ;;  %v1765_v38 = vsel %vm890_vm1, %v891_v27, %v892_v28  ;;  %v901_v39 = vrot.slane %v173_v10, 2 }
  0x1c   : > { %v548_v34 = vcombine.low %v1726_v15, %v1734_v19  ;;  %v897_v40 = vrot.slane %v1696_v0, 2  ;;  %v898_v41 = vrot.slane %v171_v11, 2  ;;  %v182_v44 = vrot.slane %v174_v31, %v1746_v29 }
  0x1d   : > { %v572_v42 = vrot.slane %v564_v30, %v1746_v29  ;;  %v198_v45 = vrot.slane %v190_v37, %v1746_v29  ;;  %v1777_v47 = vsel %vm890_vm1, %v900_v36, %v901_v39  ;;  %v565_v55 = vcombine.high %v1724_v14, %v1732_v18 }
  0x1e   : > { %411 = vrot.lane.b32.xlu1 %v1706_v3, %s1627_s23  ;;  %409 = vrot.lane.b32.xlu0 %v1698_v1, %s1627_s23  ;;  %v556_v43 = vrot.slane %v548_v34, %v1746_v29  ;;  %v1780_v48 = vsel %vm890_vm1, %v897_v40, %v898_v41  ;;  %v549_v56 = vcombine.high %v1726_v15, %v1734_v19 }
  0x1f   : > { %v206_v49 = vcombine.low %v182_v44, %v198_v45  ;;  %v207_v57 = vcombine.high %v182_v44, %v198_v45  ;;  %v191_v58 = vcombine.high %v1706_v3, %v1704_v2  ;;  %v189_v63 = vrot.slane %v175_v54, %v1746_v29 }
  0x20   : > { %v580_v51 = vcombine.low %v556_v43, %v572_v42  ;;  %v581_v62 = vcombine.high %v556_v43, %v572_v42  ;;  %v907_v1 = vcombine.low %v1765_v38, %v1780_v48  ;;  %v563_v5 = vrot.slane %v549_v56, %v1746_v29 }
  0x21   : > { %v1793_v52 = vrot.slane %v206_v49, %v1786_v50  ;;  %v205_v3 = vrot.slane %v191_v58, %v1746_v29  ;;  %v579_v6 = vrot.slane %v565_v55, %v1746_v29  ;;  %v924_v20 = vcombine.high %v1759_v35, %v1777_v47 }
  0x22   : > { %415 = vrot.lane.b32.xlu1 %v1704_v2, %s1627_s23  ;;  %413 = vrot.lane.b32.xlu0 %v1696_v0, %s1627_s23  ;;  %v1796_v53 = vrot.slane %v580_v51, %v1786_v50  ;;  %v923_v0 = vcombine.low %v1759_v35, %v1777_v47  ;;  %v221_v2 = vrot.slane %v207_v57, %v1786_v50 }
  0x23   : > { %v238_v60 = vcombine.high %v1793_v52, %v1630_v59  ;;  %v595_v4 = vrot.slane %v581_v62, %v1786_v50  ;;  %v915_v8 = vrot.slane %v907_v1, %v1746_v29  ;;  %v222_v10 = vcombine.low %v189_v63, %v205_v3 }
  0x24   : > { %v612_v61 = vcombine.high %v1796_v53, %v1630_v59  ;;  %v931_v7 = vrot.slane %v923_v0, %v1746_v29  ;;  %v239_v9 = vcombine.high %v221_v2, %v1630_v59  ;;  %v596_v12 = vcombine.low %v563_v5, %v579_v6 }
  0x25   : > { %v613_v11 = vcombine.high %v595_v4, %v1630_v59  ;;  %v908_v21 = vcombine.high %v1765_v38, %v1780_v48  ;;  %v223_v23 = vcombine.high %v189_v63, %v205_v3  ;;  %v1856_v26 = vrot.slane %v924_v20, %v1746_v29 }
  0x26   : > { %656 = vrot.lane.b32.xlu1 %v1724_v14, %s1626_s22  ;;  %654 = vrot.lane.b32.xlu0 %v1726_v15, %s1626_s22  ;;  %v939_v13 = vcombine.low %v915_v8, %v931_v7  ;;  %v940_v27 = vcombine.high %v915_v8, %v931_v7 }
  0x27   : > { %v1853_v25 = vrot.slane %v908_v21, %v1746_v29  ;;  %v237_v28 = vrot.slane %v223_v23, %v1786_v50 }
  0x28   : > { %v1837_v16 = vrot.slane %v939_v13, %v1786_v50  ;;  %v954_v32 = vrot.slane %v940_v27, %v1786_v50 }
  0x29   : > { %v956_v31 = vcombine.high %v1853_v25, %v1856_v26  ;;  %v241_v33 = vcombine.high %v237_v28, %v1630_v59 }
  0x2a   : > { %660 = vrot.lane.b32.xlu1 %v1732_v18, %s1626_s22  ;;  %658 = vrot.lane.b32.xlu0 %v1734_v19, %s1626_s22  ;;  %v971_v22 = vcombine.high %v1837_v16, %v1630_v59  ;;  %v972_v34 = vcombine.high %v954_v32, %v1630_v59 }
  0x2e   : > { %774 = vrot.lane.b32.xlu1 %v1724_v14, %s1627_s23  ;;  %772 = vrot.lane.b32.xlu0 %v1726_v15, %s1627_s23  ;;  %v230_v14 = vrot.slane %v222_v10, %v1786_v50  ;;  %v604_v15 = vrot.slane %v596_v12, %v1786_v50 }
  0x30   : > { %v240_v17 = vcombine.high %v230_v14, %v1630_v59 }
  0x32   : > { %778 = vrot.lane.b32.xlu1 %v1732_v18, %s1627_s23  ;;  %776 = vrot.lane.b32.xlu0 %v1734_v19, %s1627_s23  ;;  %v614_v18 = vcombine.high %v604_v15, %v1630_v59  ;;  %v597_v19 = vcombine.high %v563_v5, %v579_v6 }
  0x34   : > { %v611_v24 = vrot.slane %v597_v19, %v1786_v50 }
  0x36   : > { %1015 = vrot.lane.b32.xlu1 %v1759_v35, %s1626_s22  ;;  %1013 = vrot.lane.b32.xlu0 %v1765_v38, %s1626_s22  ;;  %v615_v30 = vcombine.high %v611_v24, %v1630_v59 }
  0x3a   : > { %1019 = vrot.lane.b32.xlu1 %v1777_v47, %s1626_s22  ;;  %1017 = vrot.lane.b32.xlu0 %v1780_v48, %s1626_s22 }
  0x3e   : > { %1133 = vrot.lane.b32.xlu1 %v1759_v35, %s1627_s23  ;;  %1131 = vrot.lane.b32.xlu0 %v1765_v38, %s1627_s23  ;;  %v955_v35 = vcombine.low %v1853_v25, %v1856_v26 }
  0x40   : > { %v1875_v36 = vrot.slane %v955_v35, %v1786_v50 }
  0x42   : > { %1137 = vrot.lane.b32.xlu1 %v1777_v47, %s1627_s23  ;;  %1135 = vrot.lane.b32.xlu0 %v1780_v48, %s1627_s23 }
  0x46   : > { %243 = vrot.lane.b32.xlu0 %v238_v60, %s1631_s24  ;;  %617 = vrot.lane.b32.xlu1 %v612_v61, %s1631_s24 }
  0x4a   : > { %247 = vrot.lane.b32.xlu0 %v221_v2, %s1632_s25  ;;  %621 = vrot.lane.b32.xlu1 %v595_v4, %s1632_s25 }
  0x4e   : > { %251 = vrot.lane.b32.xlu0 %v239_v9, %s1633_s26  ;;  %625 = vrot.lane.b32.xlu1 %v613_v11, %s1633_s26 }
  0x52   : > { %255 = vrot.lane.b32.xlu0 %v230_v14, %s1634_s27  ;;  %629 = vrot.lane.b32.xlu1 %v604_v15, %s1634_s27 }
  0x56   : > { %259 = vrot.lane.b32.xlu0 %v240_v17, %s1635_s28  ;;  %633 = vrot.lane.b32.xlu1 %v614_v18, %s1635_s28 }
  0x5a   : > { %976 = vrot.lane.b32.xlu0 %v971_v22, %s1631_s24  ;;  %637 = vrot.lane.b32.xlu1 %v611_v24, %s1636_s29 }
  0x5e   : > { %263 = vrot.lane.b32.xlu0 %v237_v28, %s1636_s29  ;;  %641 = vrot.lane.b32.xlu1 %v615_v30, %s1637_s30 }
  0x62   : > { %980 = vrot.lane.b32.xlu0 %v954_v32, %s1632_s25 }
  0x66   : > { %267 = vrot.lane.b32.xlu0 %v241_v33, %s1637_s30 }
  0x6a   : > { %984 = vrot.lane.b32.xlu0 %v972_v34, %s1633_s26 }
  0x6e   : > { %988 = vrot.lane.b32.xlu0 %v1875_v36, %s1634_s27 }
  0x88   : > { %v296_v37 = vpop.permute.xlu1 %295  ;;  %v292_v38 = vpop.permute.xlu0 %291 }
  0x89   : > { %v303_v39 = vcombine.low %v292_v38, %v296_v37  ;;  %v304_v42 = vcombine.high %v292_v38, %v296_v37 }
  0x8b   : > { %v311_v45 = vrot.slane %v303_v39, %v1746_v29  ;;  %v318_v51 = vrot.slane %v304_v42, %v1746_v29 }
  0x8c   : > { %v298_v40 = vpop.permute.xlu1 %297  ;;  %v294_v41 = vpop.permute.xlu0 %293 }
  0x8d   : > { %v319_v43 = vcombine.low %v294_v41, %v298_v40  ;;  %v320_v44 = vcombine.high %v294_v41, %v298_v40 }
  0x8f   : > { %v327_v46 = vrot.slane %v319_v43, %v1746_v29  ;;  %v334_v47 = vrot.slane %v320_v44, %v1746_v29 }
  0x90   : > { %v412_v48 = vpop.permute.xlu1 %411  ;;  %v410_v49 = vpop.permute.xlu0 %409 }
  0x91   : > { %v336_v54 = vcombine.high %v311_v45, %v327_v46  ;;  %v351_v55 = vcombine.low %v318_v51, %v334_v47  ;;  %v335_v0 = vcombine.low %v311_v45, %v327_v46  ;;  %v352_v1 = vcombine.high %v318_v51, %v334_v47 }
  0x93   : > { %v350_v56 = vrot.slane %v336_v54, %v1786_v50  ;;  %v359_v4 = vrot.slane %v351_v55, %v1786_v50  ;;  %v366_v10 = vrot.slane %v352_v1, %v1786_v50  ;;  %v1898_v12 = vrot.slane %v335_v0, %v1786_v50 }
  0x94   : > { %v416_v57 = vpop.permute.xlu1 %415  ;;  %v414_v58 = vpop.permute.xlu0 %413 }
  0x95   : > { %v437_v60 = vcombine.low %v412_v48, %v416_v57  ;;  %v438_v61 = vcombine.high %v412_v48, %v416_v57  ;;  %v421_v62 = vcombine.low %v410_v49, %v414_v58  ;;  %v422_v63 = vcombine.high %v410_v49, %v414_v58  ;;  %376 = vrot.lane.b32.xlu1 %v350_v56, %s1632_s25 }
  0x96   : > { %v367_v17 = vcombine.high %v1898_v12, %v1630_v59  ;;  %v368_v23 = vcombine.high %v350_v56, %v1630_v59  ;;  %v369_v37 = vcombine.high %v359_v4, %v1630_v59  ;;  %v370_v44 = vcombine.high %v366_v10, %v1630_v59 }
  0x97   : > { %v445_v2 = vrot.slane %v437_v60, %v1746_v29  ;;  %v429_v3 = vrot.slane %v421_v62, %v1746_v29  ;;  %v452_v5 = vrot.slane %v438_v61, %v1746_v29  ;;  %v436_v6 = vrot.slane %v422_v63, %v1746_v29 }
  0x98   : > { %v1890_v7 = vpop.permute.xlu1 %656  ;;  %v1892_v8 = vpop.permute.xlu0 %654 }
  0x99   : > { %v454_v9 = vcombine.high %v429_v3, %v445_v2  ;;  %384 = vrot.lane.b32.xlu1 %v359_v4, %s1634_s27  ;;  %v469_v13 = vcombine.low %v436_v6, %v452_v5  ;;  %v453_v18 = vcombine.low %v429_v3, %v445_v2  ;;  %v470_v19 = vcombine.high %v436_v6, %v452_v5 }
  0x9b   : > { %v468_v11 = vrot.slane %v454_v9, %v1786_v50  ;;  %v477_v22 = vrot.slane %v469_v13, %v1786_v50  ;;  %v484_v28 = vrot.slane %v470_v19, %v1786_v50  ;;  %v1914_v30 = vrot.slane %v453_v18, %v1786_v50 }
  0x9c   : > { %v1900_v14 = vpop.permute.xlu1 %660  ;;  %v1902_v15 = vpop.permute.xlu0 %658 }
  0x9d   : > { %392 = vrot.lane.b32.xlu1 %v366_v10, %s1636_s29  ;;  %494 = vrot.lane.b32.xlu0 %v468_v11, %s1632_s25  ;;  %v485_v40 = vcombine.high %v1914_v30, %v1630_v59  ;;  %v682_v45 = vcombine.low %v1890_v7, %v1900_v14  ;;  %v666_v46 = vcombine.low %v1892_v8, %v1902_v15 }
  0x9e   : > { %v486_v49 = vcombine.high %v468_v11, %v1630_v59  ;;  %v683_v51 = vcombine.high %v1890_v7, %v1900_v14  ;;  %v667_v56 = vcombine.high %v1892_v8, %v1902_v15  ;;  %v487_v3 = vcombine.high %v477_v22, %v1630_v59 }
  0x9f   : > { %v690_v1 = vrot.slane %v682_v45, %v1746_v29  ;;  %v674_v2 = vrot.slane %v666_v46, %v1746_v29  ;;  %v1638_v7 = vmov 0.0|0.0  }
  0xa0   : > { %v775_v20 = vpop.permute.xlu1 %774  ;;  %v773_v21 = vpop.permute.xlu0 %772  ;;  %1499 = vmatprep.subr.bf16.mxu0 %v1638_v7  ;;  %1515 = vmatprep.subr.bf16.mxu1 %v1638_v7  ;;  %v1978_v13 = vrot.slane %v683_v51, %v1746_v29  ;;  %v1981_v14 = vrot.slane %v667_v56, %v1746_v29 }
  0xa1   : > { %372 = vrot.lane.b32.xlu1 %v367_v17, %s1631_s24  ;;  %502 = vrot.lane.b32.xlu0 %v477_v22, %s1634_s27  ;;  %v699_v15 = vcombine.high %v674_v2, %v690_v1  ;;  %v488_v17 = vcombine.high %v484_v28, %v1630_v59 }
  0xa4   : > { %v779_v24 = vpop.permute.xlu1 %778  ;;  %v777_v27 = vpop.permute.xlu0 %776 }
  0xa5   : > { %v800_v32 = vcombine.low %v775_v20, %v779_v24  ;;  %v784_v33 = vcombine.low %v773_v21, %v777_v27  ;;  %380 = vrot.lane.b32.xlu1 %v368_v23, %s1633_s26  ;;  %510 = vrot.lane.b32.xlu0 %v484_v28, %s1636_s29  ;;  %v801_v41 = vcombine.high %v775_v20, %v779_v24 }
  0xa6   : > { %v785_v42 = vcombine.high %v773_v21, %v777_v27  ;;  %v698_v23 = vcombine.low %v674_v2, %v690_v1  ;;  %v714_v24 = vcombine.low %v1981_v14, %v1978_v13  ;;  %v713_v27 = vrot.slane %v699_v15, %v1786_v50 }
  0xa7   : > { %v1919_v34 = vrot.slane %v800_v32, %v1746_v29  ;;  %v1922_v35 = vrot.slane %v784_v33, %v1746_v29  ;;  %v1943_v57 = vrot.slane %v801_v41, %v1746_v29  ;;  %v973_v15 = vcombine.high %v1875_v36, %v1630_v59 }
  0xa8   : > { %v1016_v38 = vpop.permute.xlu1 %1015  ;;  %v1014_v39 = vpop.permute.xlu0 %1013  ;;  %v1946_v58 = vrot.slane %v785_v42, %v1746_v29 }
  0xa9   : > { %388 = vrot.lane.b32.xlu1 %v369_v37, %s1635_s28  ;;  %v817_v43 = vcombine.high %v1922_v35, %v1919_v34  ;;  %490 = vrot.lane.b32.xlu0 %v485_v40, %s1631_s24  ;;  %v816_v20 = vcombine.low %v1922_v35, %v1919_v34  ;;  %v722_v37 = vrot.slane %v714_v24, %v1786_v50 }
  0xaa   : > { %v832_v8 = vcombine.low %v1946_v58, %v1943_v57 }
  0xab   : > { %v1950_v60 = vrot.slane %v817_v43, %v1786_v50  ;;  %v2008_v35 = vrot.slane %v816_v20, %v1786_v50  ;;  %v732_v2 = vcombine.high %v722_v37, %v1630_v59 }
  0xac   : > { %v1020_v47 = vpop.permute.xlu1 %1019  ;;  %v1018_v48 = vpop.permute.xlu0 %1017  ;;  %v1996_v22 = vrot.slane %v832_v8, %v1786_v50 }
  0xad   : > { %v1041_v54 = vcombine.low %v1016_v38, %v1020_v47  ;;  %v1025_v55 = vcombine.low %v1014_v39, %v1018_v48  ;;  %396 = vrot.lane.b32.xlu1 %v370_v44, %s1637_s30  ;;  %498 = vrot.lane.b32.xlu0 %v486_v49, %s1633_s26  ;;  %v1042_v61 = vcombine.high %v1016_v38, %v1020_v47 }
  0xae   : > { %v1026_v63 = vcombine.high %v1014_v39, %v1018_v48  ;;  %v2012_v38 = vrot.slane %v698_v23, %v1786_v50  ;;  %v848_v43 = vcombine.high %v2008_v35, %v1630_v59 }
  0xaf   : > { %v1049_v62 = vrot.slane %v1041_v54, %v1746_v29  ;;  %v1033_v0 = vrot.slane %v1025_v55, %v1746_v29  ;;  %v1968_v9 = vrot.slane %v1042_v61, %v1746_v29  ;;  %v731_v55 = vcombine.high %v713_v27, %v1630_v59 }
  0xb0   : > { %v1957_v4 = vpop.permute.xlu1 %1133  ;;  %v1959_v5 = vpop.permute.xlu0 %1131  ;;  %v1971_v10 = vrot.slane %v1026_v63, %v1746_v29  ;;  %v730_v46 = vcombine.high %v2012_v38, %v1630_v59 }
  0xb1   : > { %v1058_v6 = vcombine.high %v1033_v0, %v1049_v62  ;;  %857 = vrot.lane.b32.xlu1 %v1950_v60, %s1632_s25  ;;  %506 = vrot.lane.b32.xlu0 %v487_v3, %s1635_s28  ;;  %v1057_v33 = vcombine.low %v1033_v0, %v1049_v62  ;;  %v849_v0 = vcombine.high %v1950_v60, %v1630_v59 }
  0xb2   : > { %v1073_v21 = vcombine.low %v1971_v10, %v1968_v9 }
  0xb3   : > { %v1974_v11 = vrot.slane %v1058_v6, %v1786_v50  ;;  %v2024_v44 = vrot.slane %v1057_v33, %v1786_v50 }
  0xb4   : > { %v1984_v18 = vpop.permute.xlu1 %1137  ;;  %v1986_v19 = vpop.permute.xlu0 %1135  ;;  %v2005_v34 = vrot.slane %v1073_v21, %v1786_v50 }
  0xb5   : > { %1098 = vrot.lane.b32.xlu1 %v1974_v11, %s1632_s25  ;;  %514 = vrot.lane.b32.xlu0 %v488_v17, %s1637_s30  ;;  %v1159_v41 = vcombine.low %v1957_v4, %v1984_v18  ;;  %v1143_v42 = vcombine.low %v1959_v5, %v1986_v19 }
  0xb7   : > { %v2033_v49 = vrot.slane %v1159_v41, %v1746_v29  ;;  %v2036_v51 = vrot.slane %v1143_v42, %v1746_v29  ;;  %v1074_v42 = vcombine.high %v1971_v10, %v1968_v9  ;;  %v1144_v9 = vcombine.high %v1959_v5, %v1986_v19 }
  0xb8   : > { %v244_v28 = vpop.permute.xlu0 %243  ;;  %v618_v32 = vpop.permute.xlu1 %617 }
  0xb9   : > { %865 = vrot.lane.b32.xlu1 %v1996_v22, %s1634_s27  ;;  %739 = vrot.lane.b32.xlu0 %v713_v27, %s1632_s25  ;;  %v644_v45 = vsel %vm270_vm2, %v1796_v53, %v618_v32  ;;  %v1089_v53 = vcombine.high %v2024_v44, %v1630_v59  ;;  %v1175_v63 = vcombine.low %v2036_v51, %v2033_v49 }
  0xba   : > { %v271_v1 = vsel %vm270_vm2, %v1793_v52, %v244_v28  ;;  %v1090_v52 = vcombine.high %v1974_v11, %v1630_v59  ;;  %v850_v28 = vcombine.high %v1996_v22, %v1630_v59  ;;  %v833_v11 = vcombine.high %v1946_v58, %v1943_v57 }
  0xbb   : > { %v2058_v17 = vrot.slane %v1175_v63, %v1786_v50  ;;  %v715_v22 = vcombine.high %v1981_v14, %v1978_v13  ;;  %v1091_v57 = vcombine.high %v2005_v34, %v1630_v59  ;;  %v1088_v10 = vrot.slane %v1074_v42, %v1786_v50 }
  0xbc   : > { %v248_v39 = vpop.permute.xlu0 %247  ;;  %v622_v40 = vpop.permute.xlu1 %621 }
  0xbd   : > { %1106 = vrot.lane.b32.xlu1 %v2005_v34, %s1634_s27  ;;  %747 = vrot.lane.b32.xlu0 %v722_v37, %s1634_s27  ;;  %v645_v54 = vsel %vm272_vm3, %v644_v45, %v622_v40  ;;  %v273_v60 = vsel %vm272_vm3, %v271_v1, %v248_v39  ;;  %v1207_v36 = vcombine.high %v2058_v17, %v1630_v59 }
  0xbe   : > { %v729_v14 = vrot.slane %v715_v22, %v1786_v50  ;;  %v1160_v34 = vcombine.high %v1957_v4, %v1984_v18  ;;  %v1176_v4 = vcombine.high %v2036_v51, %v2033_v49  ;;  %v1158_v18 = vrot.slane %v1144_v9, %v1746_v29 }
  0xbf   : > { %v1092_v63 = vcombine.high %v1088_v10, %v1630_v59 }
  0xc0   : > { %v252_v47 = vpop.permute.xlu0 %251  ;;  %v626_v48 = vpop.permute.xlu1 %625  ;;  %v1174_v5 = vrot.slane %v1160_v34, %v1746_v29  ;;  %v733_v19 = vcombine.high %v729_v14, %v1630_v59 }
  0xc1   : > { %853 = vrot.lane.b32.xlu1 %v848_v43, %s1631_s24  ;;  %735 = vrot.lane.b32.xlu0 %v730_v46, %s1631_s24  ;;  %v646_v62 = vsel %vm274_vm4, %v645_v54, %v626_v48  ;;  %v275_v24 = vsel %vm274_vm4, %v273_v60, %v252_v47  ;;  %v847_v43 = vrot.slane %v833_v11, %v1786_v50 }
  0xc2   : > { %v970_v47 = vrot.slane %v956_v31, %v1786_v50  ;;  %v1190_v31 = vrot.slane %v1176_v4, %v1786_v50 }
  0xc3   : > { %v851_v51 = vcombine.high %v847_v43, %v1630_v59 }
  0xc4   : > { %v256_v56 = vpop.permute.xlu0 %255  ;;  %v630_v61 = vpop.permute.xlu1 %629  ;;  %v974_v26 = vcombine.high %v970_v47, %v1630_v59 }
  0xc5   : > { %1094 = vrot.lane.b32.xlu1 %v1089_v53, %s1631_s24  ;;  %743 = vrot.lane.b32.xlu0 %v731_v55, %s1633_s26  ;;  %v647_v6 = vsel %vm276_vm5, %v646_v62, %v630_v61  ;;  %v277_v32 = vsel %vm276_vm5, %v275_v24, %v256_v56  ;;  %v1191_v55 = vcombine.low %v1158_v18, %v1174_v5 }
  0xc6   : > { %v1192_v56 = vcombine.high %v1158_v18, %v1174_v5  ;;  %v1208_v61 = vcombine.high %v1190_v31, %v1630_v59 }
  0xc7   : > { %v1199_v62 = vrot.slane %v1191_v55, %v1786_v50 }
  0xc8   : > { %v260_v3 = vpop.permute.xlu0 %259  ;;  %v634_v8 = vpop.permute.xlu1 %633  ;;  %v1206_v1 = vrot.slane %v1192_v56, %v1786_v50 }
  0xc9   : > { %861 = vrot.lane.b32.xlu1 %v849_v0, %s1633_s26  ;;  %751 = vrot.lane.b32.xlu0 %v732_v2, %s1635_s28  ;;  %v648_v20 = vsel %vm278_vm6, %v647_v6, %v634_v8  ;;  %v279_v58 = vsel %vm278_vm6, %v277_v32, %v260_v3  ;;  %v1209_v0 = vcombine.high %v1199_v62, %v1630_v59  ;;  %v1639_v2 = vmov 1.0  }
  0xca   : > { %1249 = vst [vmem:[#allocation2 + $0x48] sm:$0x1] %v1639_v2  ;;  %v1210_v3 = vcombine.high %v1206_v1, %v1630_v59 }
  0xcc   : > { %v977_v21 = vpop.permute.xlu0 %976  ;;  %v638_v23 = vpop.permute.xlu1 %637 }
  0xcd   : > { %1102 = vrot.lane.b32.xlu1 %v1090_v52, %s1633_s26  ;;  %992 = vrot.lane.b32.xlu0 %v973_v15, %s1635_s28  ;;  %v649_v27 = vsel %vm280_vm7, %v648_v20, %v638_v23  ;;  %v1003_v40 = vsel %vm270_vm2, %v1837_v16, %v977_v21 }
  0xd0   : > { %v264_v33 = vpop.permute.xlu0 %263  ;;  %v642_v37 = vpop.permute.xlu1 %641 }
  0xd1   : > { %869 = vrot.lane.b32.xlu1 %v850_v28, %s1635_s28  ;;  %v650_v39 = vsel %vm282_vm8, %v649_v27, %v642_v37  ;;  %1212 = vrot.lane.b32.xlu0 %v1207_v36, %s1631_s24  ;;  %v281_v13 = vsel %vm280_vm7, %v279_v58, %v264_v33 }
  0xd2   : > { %651 = vst [vmem:[#allocation2 + $0xc] sm:$0xf] %v650_v39  ;;  %v652_v41 = vmul.f32 %v650_v39, %v650_v39 }
  0xd4   : > { %v981_v45 = vpop.permute.xlu0 %980  ;;  %653 = vst [vmem:[#allocation2 + $0x30] sm:$0xf] %v652_v41 }
  0xd5   : > { %1110 = vrot.lane.b32.xlu1 %v1091_v57, %s1635_s28  ;;  %v1004_v16 = vsel %vm272_vm3, %v1003_v40, %v981_v45  ;;  %873 = vrot.lane.b32.xlu0 %v847_v43, %s1636_s29 }
  0xd8   : > { %v268_v46 = vpop.permute.xlu0 %267 }
  0xd9   : > { %755 = vrot.lane.b32.xlu1 %v729_v14, %s1636_s29  ;;  %v283_v48 = vsel %vm282_vm8, %v281_v13, %v268_v46  ;;  %1114 = vrot.lane.b32.xlu0 %v1088_v10, %s1636_s29 }
  0xda   : > { %284 = vst [vmem:[#allocation2] sm:$0xf] %v283_v48  ;;  %v285_v54 = vmul.f32 %v283_v48, %v283_v48 }
  0xdc   : > { %286 = vst [vmem:[#allocation2 + $0x24] sm:$0xf] %v285_v54  ;;  %v985_v53 = vpop.permute.xlu0 %984 }
  0xdd   : > { %996 = vrot.lane.b32.xlu1 %v970_v47, %s1636_s29  ;;  %v1005_v25 = vsel %vm274_vm4, %v1004_v16, %v985_v53  ;;  %759 = vrot.lane.b32.xlu0 %v733_v19, %s1637_s30 }
  0xe0   : > { %v989_v49 = vpop.permute.xlu0 %988 }
  0xe1   : > { %1216 = vrot.lane.b32.xlu1 %v1190_v31, %s1632_s25  ;;  %v2117_v29 = vsel %vm276_vm5, %v1005_v25, %v989_v49  ;;  %1000 = vrot.lane.b32.xlu0 %v974_v26, %s1637_s30 }
  0xe5   : > { %877 = vrot.lane.b32.xlu1 %v851_v51, %s1637_s30  ;;  %1220 = vrot.lane.b32.xlu0 %v1208_v61, %s1633_s26 }
  0xe9   : > { %1118 = vrot.lane.b32.xlu1 %v1092_v63, %s1637_s30  ;;  %1228 = vrot.lane.b32.xlu0 %v1209_v0, %s1635_s28 }
  0xed   : > { %1224 = vrot.lane.b32.xlu1 %v1199_v62, %s1634_s27  ;;  %1236 = vrot.lane.b32.xlu0 %v1210_v3, %s1637_s30 }
  0xf1   : > { %1232 = vrot.lane.b32.xlu1 %v1206_v1, %s1636_s29 }
 0x107   : > { %v377_v50 = vpop.permute.xlu1 %376 }
 0x10b   : > { %v385_v6 = vpop.permute.xlu1 %384 }
 0x10f   : > { %v393_v8 = vpop.permute.xlu1 %392  ;;  %v495_v15 = vpop.permute.xlu0 %494 }
 0x113   : > { %v373_v60 = vpop.permute.xlu1 %372  ;;  %v503_v20 = vpop.permute.xlu0 %502 }
 0x114   : > { %v399_v52 = vsel %vm270_vm2, %v1898_v12, %v373_v60 }
 0x115   : > { %v400_v21 = vsel %vm272_vm3, %v399_v52, %v377_v50 }
 0x117   : > { %v381_v23 = vpop.permute.xlu1 %380  ;;  %v511_v36 = vpop.permute.xlu0 %510 }
 0x118   : > { %v401_v24 = vsel %vm274_vm4, %v400_v21, %v381_v23 }
 0x119   : > { %v402_v27 = vsel %vm276_vm5, %v401_v24, %v385_v6 }
 0x11b   : > { %v389_v28 = vpop.permute.xlu1 %388  ;;  %v491_v32 = vpop.permute.xlu0 %490 }
 0x11c   : > { %v403_v11 = vsel %vm278_vm6, %v402_v27, %v389_v28  ;;  %v517_v33 = vsel %vm270_vm2, %v1914_v30, %v491_v32 }
 0x11d   : > { %v404_v37 = vsel %vm280_vm7, %v403_v11, %v393_v8  ;;  %v518_v40 = vsel %vm272_vm3, %v517_v33, %v495_v15 }
 0x11f   : > { %v397_v39 = vpop.permute.xlu1 %396  ;;  %v499_v41 = vpop.permute.xlu0 %498 }
 0x120   : > { %v405_v12 = vsel %vm282_vm8, %v404_v37, %v397_v39  ;;  %v519_v57 = vsel %vm274_vm4, %v518_v40, %v499_v41 }
 0x121   : > { %406 = vst [vmem:[#allocation2 + $0x4] sm:$0xf] %v405_v12  ;;  %v407_v22 = vmul.f32 %v405_v12, %v405_v12  ;;  %v520_v42 = vsel %vm276_vm5, %v519_v57, %v503_v20 }
 0x123   : > { %408 = vst [vmem:[#allocation2 + $0x28] sm:$0xf] %v407_v22  ;;  %v858_v58 = vpop.permute.xlu1 %857  ;;  %v507_v43 = vpop.permute.xlu0 %506 }
 0x124   : > { %v521_v45 = vsel %vm278_vm6, %v520_v42, %v507_v43 }
 0x125   : > { %v522_v16 = vsel %vm280_vm7, %v521_v45, %v511_v36 }
 0x127   : > { %v1099_v30 = vpop.permute.xlu1 %1098  ;;  %v515_v13 = vpop.permute.xlu0 %514 }
 0x128   : > { %v523_v14 = vsel %vm282_vm8, %v522_v16, %v515_v13  ;;  %v1253_v48 = vld [vmem:[#allocation2] sm:$0xff] }
 0x129   : > { %524 = vst [vmem:[#allocation2 + $0x8] sm:$0xf] %v523_v14  ;;  %v525_v34 = vmul.f32 %v523_v14, %v523_v14 }
 0x12b   : > { %v866_v9 = vpop.permute.xlu1 %865  ;;  %526 = vst [vmem:[#allocation2 + $0x2c] sm:$0xf] %v525_v34  ;;  %v740_v10 = vpop.permute.xlu0 %739 }
 0x12f   : > { %v1107_v46 = vpop.permute.xlu1 %1106  ;;  %v748_v47 = vpop.permute.xlu0 %747 }
 0x130   : > { %v1254_v54 = vld [vmem:[#allocation2 + $0x8] sm:$0xff] }
 0x131   : > { %v1500_v4 = vpack.c.bf16 %v1254_v54, %v1253_v48 }
 0x133   : > { %v854_v5 = vpop.permute.xlu1 %853  ;;  %1501 = vmatpush3.bf16.msra.mxu0 %v1500_v4  ;;  %1520 = vmatpush3.bf16.msra.mxu1 %v1500_v4  ;;  %v736_v18 = vpop.permute.xlu0 %735 }
 0x134   : > { %1502 = vmatprep.subr.bf16.mxu0 %v1638_v7  ;;  %1516 = vmatprep.subr.bf16.mxu1 %v1638_v7  ;;  %v762_v56 = vsel %vm270_vm2, %v2012_v38, %v736_v18  ;;  %v880_v3 = vsel %vm270_vm2, %v2008_v35, %v854_v5 }
 0x135   : > { %v763_v63 = vsel %vm272_vm3, %v762_v56, %v740_v10  ;;  %v881_v38 = vsel %vm272_vm3, %v880_v3, %v858_v58 }
 0x137   : > { %v1095_v19 = vpop.permute.xlu1 %1094  ;;  %v744_v53 = vpop.permute.xlu0 %743 }
 0x138   : > { %v764_v0 = vsel %vm274_vm4, %v763_v63, %v744_v53  ;;  %v1121_v20 = vsel %vm270_vm2, %v2024_v44, %v1095_v19  ;;  %v1258_v53 = vld [vmem:[#allocation2 + $0x28] sm:$0xff] }
 0x139   : > { %v765_v50 = vsel %vm276_vm5, %v764_v0, %v748_v47  ;;  %v1122_v28 = vsel %vm272_vm3, %v1121_v20, %v1099_v30 }
 0x13b   : > { %v862_v25 = vpop.permute.xlu1 %861  ;;  %v752_v26 = vpop.permute.xlu0 %751 }
 0x13c   : > { %v766_v6 = vsel %vm278_vm6, %v765_v50, %v752_v26  ;;  %v882_v21 = vsel %vm274_vm4, %v881_v38, %v862_v25 }
 0x13d   : > { %v883_v11 = vsel %vm276_vm5, %v882_v21, %v866_v9 }
 0x13f   : > { %v1103_v31 = vpop.permute.xlu1 %1102  ;;  %v993_v55 = vpop.permute.xlu0 %992 }
 0x140   : > { %v1007_v35 = vsel %vm278_vm6, %v2117_v29, %v993_v55  ;;  %v1123_v44 = vsel %vm274_vm4, %v1122_v28, %v1103_v31 }
 0x141   : > { %v1124_v41 = vsel %vm276_vm5, %v1123_v44, %v1107_v46 }
 0x143   : > { %v870_v49 = vpop.permute.xlu1 %869  ;;  %v1213_v51 = vpop.permute.xlu0 %1212 }
 0x144   : > { %v884_v33 = vsel %vm278_vm6, %v883_v11, %v870_v49  ;;  %v1239_v45 = vsel %vm270_vm2, %v2058_v17, %v1213_v51  ;;  %v1262_v51 = vld [vmem:[#allocation2 + $0x48] sm:$0x1] }
 0x147   : > { %v1111_v61 = vpop.permute.xlu1 %1110  ;;  %v874_v62 = vpop.permute.xlu0 %873 }
 0x148   : > { %v885_v39 = vsel %vm280_vm7, %v884_v33, %v874_v62  ;;  %v1125_v57 = vsel %vm278_vm6, %v1124_v41, %v1111_v61  ;;  %v1250_v61 = vld [vmem:[%s2231_s1] sm:$0xff]  ;;  %v1251_v62 = vld [vmem:[%s2231_s1 + $0x8] sm:$0xff] }
 0x14b   : > { %v756_v1 = vpop.permute.xlu1 %755  ;;  %v1115_v2 = vpop.permute.xlu0 %1114 }
 0x14c   : > { %v767_v15 = vsel %vm280_vm7, %v766_v6, %v756_v1  ;;  %v1126_v58 = vsel %vm280_vm7, %v1125_v57, %v1115_v2 }
 0x14f   : > { %v997_v8 = vpop.permute.xlu1 %996  ;;  %v760_v60 = vpop.permute.xlu0 %759 }
 0x150   : > { %v768_v52 = vsel %vm282_vm8, %v767_v15, %v760_v60  ;;  %v1008_v36 = vsel %vm280_vm7, %v1007_v35, %v997_v8 }
 0x151   : > { %769 = vst [vmem:[#allocation2 + $0x10] sm:$0xf] %v768_v52  ;;  %v770_v23 = vmul.f32 %v768_v52, %v768_v52 }
 0x153   : > { %v1217_v24 = vpop.permute.xlu1 %1216  ;;  %771 = vst [vmem:[#allocation2 + $0x34] sm:$0xf] %v770_v23  ;;  %v1001_v27 = vpop.permute.xlu0 %1000 }
 0x154   : > { %v1009_v32 = vsel %vm282_vm8, %v1008_v36, %v1001_v27  ;;  %v1240_v16 = vsel %vm272_vm3, %v1239_v45, %v1217_v24 }
 0x155   : > { %1010 = vst [vmem:[#allocation2 + $0x18] sm:$0xf] %v1009_v32  ;;  %v1011_v37 = vmul.f32 %v1009_v32, %v1009_v32 }
 0x157   : > { %v878_v29 = vpop.permute.xlu1 %877  ;;  %1012 = vst [vmem:[#allocation2 + $0x3c] sm:$0xf] %v1011_v37  ;;  %v1221_v40 = vpop.permute.xlu0 %1220 }
 0x158   : > { %v886_v12 = vsel %vm282_vm8, %v885_v39, %v878_v29  ;;  %v1241_v14 = vsel %vm274_vm4, %v1240_v16, %v1221_v40 }
 0x159   : > { %887 = vst [vmem:[#allocation2 + $0x14] sm:$0xf] %v886_v12  ;;  %v888_v22 = vmul.f32 %v886_v12, %v886_v12 }
 0x15a   : > { %v1259_v31 = vld [vmem:[#allocation2 + $0x30] sm:$0xff] }
 0x15b   : > { %889 = vst [vmem:[#allocation2 + $0x38] sm:$0xf] %v888_v22  ;;  %v1119_v42 = vpop.permute.xlu1 %1118  ;;  %v1229_v13 = vpop.permute.xlu0 %1228 }
 0x15c   : > { %v1127_v43 = vsel %vm282_vm8, %v1126_v58, %v1119_v42 }
 0x15d   : > { %1128 = vst [vmem:[#allocation2 + $0x1c] sm:$0xf] %v1127_v43  ;;  %v1129_v30 = vmul.f32 %v1127_v43, %v1127_v43 }
 0x15f   : > { %1130 = vst [vmem:[#allocation2 + $0x40] sm:$0xf] %v1129_v30  ;;  %v1225_v34 = vpop.permute.xlu1 %1224  ;;  %v1237_v47 = vpop.permute.xlu0 %1236 }
 0x160   : > { %v1242_v9 = vsel %vm276_vm5, %v1241_v14, %v1225_v34  ;;  %v1255_v54 = vld [vmem:[#allocation2 + $0x10] sm:$0xff] }
 0x161   : > { %v1243_v46 = vsel %vm278_vm6, %v1242_v9, %v1229_v13 }
 0x162   : > { %v1260_v26 = vld [vmem:[#allocation2 + $0x38] sm:$0xff] }
 0x163   : > { %v1233_v10 = vpop.permute.xlu1 %1232  ;;  %v1509_v55 = vpack.c.bf16 %v1260_v26, %v1259_v31 }
 0x164   : > { %v1244_v48 = vsel %vm280_vm7, %v1243_v46, %v1233_v10  ;;  %v1256_v4 = vld [vmem:[#allocation2 + $0x18] sm:$0xff] }
 0x165   : > { %v1245_v17 = vsel %vm282_vm8, %v1244_v48, %v1237_v47  ;;  %v1503_v5 = vpack.c.bf16 %v1256_v4, %v1255_v54 }
 0x166   : > { %1246 = vst [vmem:[#allocation2 + $0x20] sm:$0xf] %v1245_v17  ;;  %v1247_v18 = vmul.f32 %v1245_v17, %v1245_v17 }
 0x167   : > { %1504 = vmatpush3.bf16.msra.mxu0 %v1503_v5  ;;  %1521 = vmatpush3.bf16.msra.mxu1 %v1503_v5 }
 0x168   : > { %1248 = vst [vmem:[#allocation2 + $0x44] sm:$0xf] %v1247_v18  ;;  %1505 = vmatprep.subr.bf16.mxu0 %v1638_v7  ;;  %1517 = vmatprep.subr.bf16.mxu1 %v1638_v7 }
 0x16d   : > { %v1257_v19 = vld [vmem:[#allocation2 + $0x20] sm:$0xff] }
 0x16e   : > { %v1506_v25 = vpack.c.bf16 %v1258_v53, %v1257_v19 }
 0x16f   : > { %v1261_v49 = vld [vmem:[#allocation2 + $0x40] sm:$0xff] }
 0x170   : > { %1507 = vmatpush3.bf16.msra.mxu0 %v1506_v25  ;;  %1522 = vmatpush3.bf16.msra.mxu1 %v1506_v25  ;;  %v1512_v56 = vpack.c.bf16 %v1262_v51, %v1261_v49 }
 0x171   : > { %1508 = vmatprep.subr.bf16.mxu0 %v1638_v7  ;;  %1518 = vmatprep.subr.bf16.mxu1 %v1638_v7 }
 0x174   : > { %1510 = vmatpush3.bf16.msra.mxu0 %v1509_v55  ;;  %1523 = vmatpush3.bf16.msra.mxu1 %v1509_v55 }
 0x175   : > { %1511 = vmatprep.subr.bf16.mxu0 %v1638_v7  ;;  %1519 = vmatprep.subr.bf16.mxu1 %v1638_v7  ;;  %v1252_v7 = vld [vmem:[%s2231_s1 + $0x10] sm:$0xff] }
 0x178   : > { %1514 = vmatpush3.bf16.msk.msra.mxu0 %vm1513_vm12, %v1512_v56  ;;  %1524 = vmatpush3.bf16.msk.msra.mxu1 %vm1513_vm12, %v1512_v56 }
 0x17b   : > { %1491 = vmatmul.mubr.msk.f32.vlgmr.msra.gmra.mrb[0].mxu0 %vm1263_vm13, %v1250_v61  ;;  %1494 = vmatmul.mubr.msk.f32.vlgmr.msra.gmra.mrb[0].mxu1 %vm1263_vm13, %v1251_v62 }
 0x17c   : > { %1496 = vmatprep.mubr.msk.f32.mxu1 %vm1640_vm9, %v1630_v59 }
 0x17f   : > { %1497 = vmatmul.mubr.msk.f32.gmra.mrb[2].mxu1 %vm1263_vm13, %v1252_v7 }
 0x24e   : > { %v1343_v63 = vpop.f32.mrb[0].mxu0  ;;  %v1348_v0 = vpop.f32.mrb[0].mxu1 }
 0x24f   : > { %v1357_v1 = vmul.f32 %v1348_v0, %v1343_v63  ;;  %v1495_v2 = vpop.f32.mrb[1].mxu1  ;;  %v1492_v3 = vpop.f32.mrb[1].mxu0 }
 0x252   : > { %v1353_v59 = vpop.f32.mrb[2].mxu1 }
 0x253   : > { %v1358_v50 = vadd.f32 %v1357_v1, %v1353_v59  ;;  %v1498_v6 = vpop.f32.mrb[3].mxu1 }
 0x255   : > { %1359 = vst [vmem:[%s163_s21] sm:$0xf] %v1358_v50 }
 0x256 PF: > { %s12_s13 = sadd.s32 1, %s1624_s13   ;;  %s2233_s9 = smov %s1616_s11 }
 0x257   : > { %p9_p7 = scmp.ge.s32.totalorder %s12_s13, 6   ;;  %s2234_s10 = smov %s1620_s12 }
 0x258   : > { %s2235_s11 = smov %s2238_s14  ;;  %s2236_s12 = smov %s2242_s15 }
 0x259   :  { %11 = sbr.rel (!%p9_p7) target bundleno = 3 (0x3), region = 59 }

</bundles_post_ra>
